<compile_context>
chip_gen: v7x
topology: tpu7x:2x2x1
jax: 0.10.0
libtpu: 0.0.40
codegen_flags: <defaults>
</compile_context>

<pallas_src>
import math

import jax
import jax.numpy as jnp
import numpy as np
from jax.experimental import pallas as pl
from jax.experimental.pallas import tpu as pltpu


# ----------------------------------------------------------------------------- kernel

def pos_enc_kernel(x_ref, pe_ref, o_ref):
    # x_ref:  (bb, S, D)  one batch tile of the activation
    # pe_ref: (1,  S, D)  shared positional-encoding slice, broadcast over batch rows
    o_ref[...] = x_ref[...] + pe_ref[...]


# ----------------------------------------------------------------------------- wrapper

def make_pe_table(max_len: int, d_model: int) -> jnp.ndarray:
    """Sin/cos positional-encoding table, identical to the PyTorch buffer `pe`."""
    position = jnp.arange(max_len, dtype=jnp.float32)[:, None]
    div_term = jnp.exp(jnp.arange(0, d_model, 2, dtype=jnp.float32)
                       * (-math.log(10000.0) / d_model))
    pe = jnp.zeros((max_len, d_model), jnp.float32)
    pe = pe.at[:, 0::2].set(jnp.sin(position * div_term))
    pe = pe.at[:, 1::2].set(jnp.cos(position * div_term))
    return pe


@jax.jit
def positional_encoding_forward(x: jnp.ndarray, pe_table: jnp.ndarray) -> jnp.ndarray:
    """x: (B, S, D) -> x + pe[:S]  via a batch-tiled, auto-pipelined Pallas kernel."""
    B, S, D = x.shape
    assert S <= pe_table.shape[0], "seq_len exceeds max_len of the PE table"
    assert D == pe_table.shape[1], "d_model mismatch with the PE table"

    # Slice once (static S) and cast once so a bf16 caller gets a bf16 kernel.
    pe = pe_table[:S].astype(x.dtype)[None]            # (1, S, D)

    # Batch-block size: keep each in/out block around ~4 MiB so double-buffered
    # (x + out) blocks plus the resident pe slice stay well inside v7x's 32 MiB
    # scoped VMEM (and trivially inside v5e/v6e's 128 MiB physical VMEM).
    bytes_per_row = S * D * x.dtype.itemsize
    bb = max(1, min(B, (4 * 1024 * 1024) // max(bytes_per_row, 1)))
    while B % bb:                                      # bb must evenly divide B
        bb -= 1

    return pl.pallas_call(
        pos_enc_kernel,
        out_shape=jax.ShapeDtypeStruct((B, S, D), x.dtype),
        grid=(B // bb,),
        in_specs=[
            # Block last two dims equal the full (S, D) extents, so the (8,128)
            # divisibility rule is satisfied for any S, D without relayout.
            pl.BlockSpec((bb, S, D), lambda i: (i, 0, 0)),
            pl.BlockSpec((1, S, D), lambda i: (0, 0, 0)),   # pe: VMEM-resident
        ],
        out_specs=pl.BlockSpec((bb, S, D), lambda i: (i, 0, 0)),
        compiler_params=pltpu.CompilerParams(
            dimension_semantics=("parallel",)),             # v7x: 2 TCs split batch
    )(x, pe)


# ----------------------------------------------------------------------------- main

if __name__ == "__main__":
    key = jax.random.PRNGKey(0)

    B, S, D_MODEL, MAX_LEN = 2, 8, 48, 5000            # shapes implied by the module
    x = jax.random.normal(key, (B, S, D_MODEL), dtype=jnp.float32)

    pe_table = make_pe_table(MAX_LEN, D_MODEL)

    out = positional_encoding_forward(x, pe_table)
    jax.block_until_ready(out)

    # pure-JAX reference: x + pe[:, :S, :]
    ref = x + pe_table[:S][None, :, :]
    np.testing.assert_allclose(np.asarray(out), np.asarray(ref), rtol=1e-6, atol=1e-6)

    print("KERNEL_OK")
</pallas_src>

<mosaic_0001>
module attributes {stable_mosaic.version = 11 : i64} {
  func.func @pos_enc_kernel(%arg0: i32, %arg1: memref<2x8x48xf32, #tpu.memory_space<vmem>>, %arg2: memref<1x8x48xf32, #tpu.memory_space<vmem>>, %arg3: memref<2x8x48xf32, #tpu.memory_space<vmem>>) attributes {dimension_semantics = [#tpu.dimension_semantics<parallel>], iteration_bounds = array<i64: 1>, scalar_prefetch = 0 : i64, scratch_operands = 0 : i64, tpu.core_type = #tpu.core_type<tc>, window_params = [{transform_indices = @transform_0, window_bounds = array<i64: 2, 8, 48>}, {pipeline_mode = #tpu.pipeline_mode<synchronous>, transform_indices = @transform_1, window_bounds = array<i64: 1, 8, 48>}, {transform_indices = @transform_2, window_bounds = array<i64: 2, 8, 48>}]} {
    %c0 = arith.constant 0 : index
    %c0_0 = arith.constant 0 : index
    %c0_1 = arith.constant 0 : index
    %0 = vector.load %arg1[%c0, %c0_0, %c0_1] : memref<2x8x48xf32, #tpu.memory_space<vmem>>, vector<2x8x48xf32>
    %c0_2 = arith.constant 0 : index
    %c0_3 = arith.constant 0 : index
    %c0_4 = arith.constant 0 : index
    %1 = vector.load %arg2[%c0_2, %c0_3, %c0_4] : memref<1x8x48xf32, #tpu.memory_space<vmem>>, vector<1x8x48xf32>
    %2 = vector.broadcast %1 : vector<1x8x48xf32> to vector<2x8x48xf32>
    %3 = arith.addf %0, %2 : vector<2x8x48xf32>
    %c0_5 = arith.constant 0 : index
    %c0_6 = arith.constant 0 : index
    %c0_7 = arith.constant 0 : index
    %4 = vector.load %arg3[%c0_5, %c0_6, %c0_7] : memref<2x8x48xf32, #tpu.memory_space<vmem>>, vector<2x8x48xf32>
    tpu.vector_store %arg3[%c0_5, %c0_6, %c0_7], %3 {strides = array<i32>} : memref<2x8x48xf32, #tpu.memory_space<vmem>>, vector<2x8x48xf32>,
    return
  }
  func.func @transform_0(%arg0: i32) -> (i32, i32, i32) {
    %c0_i32 = arith.constant 0 : i32
    %c0_i32_0 = arith.constant 0 : i32
    %c0_i32_1 = arith.constant 0 : i32
    return %arg0, %c0_i32, %c0_i32_0 : i32, i32, i32
  }
  func.func @transform_1(%arg0: i32) -> (i32, i32, i32) {
    %c0_i32 = arith.constant 0 : i32
    %c0_i32_0 = arith.constant 0 : i32
    %c0_i32_1 = arith.constant 0 : i32
    %c0_i32_2 = arith.constant 0 : i32
    return %c0_i32, %c0_i32_0, %c0_i32_1 : i32, i32, i32
  }
  func.func @transform_2(%arg0: i32) -> (i32, i32, i32) {
    %c0_i32 = arith.constant 0 : i32
    %c0_i32_0 = arith.constant 0 : i32
    %c0_i32_1 = arith.constant 0 : i32
    return %arg0, %c0_i32, %c0_i32_0 : i32, i32, i32
  }
}

</mosaic_0001>

<bundles_post_ra>
// kernel: positional_encoding_forward.1
= control target key start
LH: loop header
LB: loop body
LE: loop exit
PB: predicated region body
PF: predicated region fallthrough
CT: control target
= control target key end

     0   :  { %vm17_vm0 = vcmask 392192   ;;  %s102_s0 = inlined_call_operand.vmem [shape: f32[2,8,48], index: 0, kind: input, shape index: {}]   ;;  %s103_s1 = inlined_call_operand.vmem [shape: f32[1,8,48], index: 1, kind: input, shape index: {}]   ;;  %s104_s2 = inlined_call_operand.hbm [shape: f32[2,8,48], index: 2, kind: output, shape index: {}]  }
   0x1   :  { %v12_v0 = vld [vmem:[%s102_s0] sm:$0xff]  ;;  %v13_v2 = vld [vmem:[%s102_s0 + $0x8] sm:$0xff] }
   0x2   :  { %v14_v1 = vld [vmem:[%s103_s1] sm:$0xff] }
   0x3   :  { %v15_v3 = vadd.f32 %v14_v1, %v12_v0  ;;  %v16_v4 = vadd.f32 %v14_v1, %v13_v2 }
   0x4   :  { %7 = vsyncpa [#allocation3], 0  ;;  %s63_s15 = smov [#allocation2]  }
   0x5   :  { %s25_s16 = sshll.u32 %s63_s15, 4  ;;  %18 = vst.msk [vmem:[#allocation2] sm:$0xff] %vm17_vm0, %v15_v3  ;;  %19 = vst.msk [vmem:[#allocation2 + $0x8] sm:$0xff] %vm17_vm0, %v16_v4  ;;  %s26_s16 = int_to_ptr.vmem [resolvable:$true] %s25_s16 }
   0x6   :  { %s39_s17 = scalar_lea.vmem %s26_s16, 256  ;;  %p44_p1 = scmp.lt.s32.totalorder %s26_s16, %s26_s16 }
   0x7   :  { %p40_p0 = scmp.ne.s32.totalorder %s26_s16, %s39_s17  ;;  %p45_p2 = scmp.lt.s32.totalorder %s39_s17, %s39_s17 }
   0x9   :  { %p46_p3 = por %p45_p2, %p44_p1 }
   0xb   :  { %p47_p4 = pnand %p46_p3, %p40_p0 }
   0xd   :  { %50 = shalt.err (!%p47_p4)
}
   0xe   :  { %s51_s19 = scalar_lea.hbm %s104_s2, 256 }
   0xf   :  { %p52_p5 = scmp.ne.s32.totalorder %s104_s2, %s51_s19  ;;  %p55_p6 = scmp.lt.u32.totalorder %s51_s19, %s104_s2 }
  0x11   :  { %p57_p7 = pnand %p55_p6, %p52_p5 }
  0x13   :  { %60 = shalt.err (!%p57_p7)
}
  0x14   :  { %s64_s23 = smov 128   ;;  %s65_s24 = smov 8  }
  0x15   :  { %31 = dma.vmem_to_hbm [thread:$0]  %s26_s16, 256, %s104_s2, [#allocation3], %s64_s23, %s64_s23, %s65_s24  }
  0x16   :  { %61 = dma.done.wait [#allocation3], 256  }
  0x17   :  { %62 = vsyncadd [#allocation3], 4294967040 }
  0x18   :  { %35 = vsyncpa [#allocation3], 1 }

</bundles_post_ra>
